<compile_context>
chip_gen: v5e
topology: v5e:2x2
jax: 0.10.0
libtpu: 0.0.40
codegen_flags: <defaults>
</compile_context>

<pallas_src>
import functools
import inspect

import jax
import jax.numpy as jnp
from jax.experimental import pallas as pl
from jax.experimental.pallas import tpu as pltpu


# ---------------------------------------------------------------------------
# helpers
# ---------------------------------------------------------------------------
def _round_up(x, m):
    return ((x + m - 1) // m) * m


def _pad_and_tile(dim, pref, align):
    """Return (padded_dim, tile): tile is a multiple of `align` and divides
    padded_dim. Prefers keeping the tile at `pref` and padding the dimension
    up (zero padding is exact for this kernel) over shrinking the tile."""
    pref = max(_round_up(pref, align), align)
    aligned = _round_up(dim, align)
    if aligned <= pref:
        return aligned, aligned
    if aligned % pref == 0:
        return aligned, pref
    # pad up to a multiple of the preferred tile (keeps tiles large/lane-dense)
    return _round_up(aligned, pref), pref


@functools.lru_cache(maxsize=1)
def _vmem_capacity_bytes():
    try:
        return int(pltpu.get_tpu_info().vmem_capacity_bytes)
    except Exception:
        return 64 << 20  # conservative: v7x per-TC VMEM


def _buffered_supported():
    try:
        return hasattr(pl, "Buffered") and (
            "pipeline_mode" in inspect.signature(pl.BlockSpec).parameters
        )
    except Exception:
        return False


_HAS_BUFFERED = _buffered_supported()


# ---------------------------------------------------------------------------
# Pallas kernel:  y[i,j] = sum_k x[i,k] * w_t[k,j] + b[j]
#   * bf16 operands, f32 accumulation directly into the resident output block
#   * bias added exactly once, on the last K step
# ---------------------------------------------------------------------------
def _matmul_bias_kernel(x_ref, wt_ref, b_ref, o_ref):
    k = pl.program_id(2)

    @pl.when(k == 0)
    def _init():
        o_ref[...] = jnp.zeros_like(o_ref)

    o_ref[...] += jnp.dot(
        x_ref[...], wt_ref[...], preferred_element_type=jnp.float32
    )

    @pl.when(k == pl.num_programs(2) - 1)
    def _bias():
        o_ref[...] += b_ref[...].astype(jnp.float32)


@functools.partial(
    jax.jit, static_argnames=("out_features", "tn", "tk", "tm_pref")
)
def linear_pallas(x, w_t, b, *, out_features, tn, tk, tm_pref=256):
    """x: [B, D_in] (unpadded); w_t: [Din_pad, Dout_pad] pre-padded,
    pre-transposed, bf16; b: [1, Dout_pad] pre-padded, f32.
    Returns [B, out_features] in x.dtype."""
    orig_dtype = x.dtype
    B, D_in = x.shape
    din_pad, dout_pad = w_t.shape

    # bf16 activations (MXU-native), sublane alignment 16 for bf16 packing.
    x = x.astype(jnp.bfloat16)
    b_pad_rows, tm = _pad_and_tile(B, tm_pref, 16)
    if b_pad_rows != B or din_pad != D_in:
        x = jnp.pad(x, ((0, b_pad_rows - B), (0, din_pad - D_in)))

    grid_i = b_pad_rows // tm
    grid_j = dout_pad // tn
    grid_k = din_pad // tk

    # Megacore: if both parallel axes collapse to one step (small-B inference),
    # halve tn so the j axis has 2 steps and v7x's second TensorCore gets work.
    if grid_i == 1 and grid_j == 1 and tn >= 256 and (tn // 2) % 128 == 0:
        tn //= 2
        grid_j = 2

    grid = (grid_i, grid_j, grid_k)

    # GEMV-like case: tiny M tile -> weight DMA latency is exposed at depth 2;
    # deepen the weight pipeline to 3 buffers when there are enough blocks.
    deepen_w = _HAS_BUFFERED and grid_i == 1 and (grid_j * grid_k) >= 3
    if deepen_w:
        w_buffers = 3
        w_spec = pl.BlockSpec(
            (tk, tn), lambda i, j, k: (k, j), pipeline_mode=pl.Buffered(3)
        )
    else:
        w_buffers = 2
        w_spec = pl.BlockSpec((tk, tn), lambda i, j, k: (k, j))

    # Generation-aware VMEM budget (bf16 operands, resident f32 output).
    needed = (
        2 * (tm * tk * 2)          # x tiles, double-buffered, bf16
        + w_buffers * (tk * tn * 2)  # weight tiles, bf16
        + 2 * (tn * 4)               # bias tiles, f32
        + 2 * (tm * tn * 4)          # output tiles, f32
    )
    cap = _vmem_capacity_bytes()
    vmem_limit = min(max(2 * needed, 32 << 20), (cap * 3) // 4)
    vmem_limit = min(max(vmem_limit, needed + (4 << 20)), cap)

    out = pl.pallas_call(
        _matmul_bias_kernel,
        out_shape=jax.ShapeDtypeStruct((b_pad_rows, dout_pad), jnp.float32),
        grid_spec=pltpu.PrefetchScalarGridSpec(
            num_scalar_prefetch=0,
            grid=grid,
            in_specs=[
                pl.BlockSpec((tm, tk), lambda i, j, k: (i, k)),
                w_spec,
                pl.BlockSpec((1, tn), lambda i, j, k: (0, j)),
            ],
            out_specs=pl.BlockSpec((tm, tn), lambda i, j, k: (i, j)),
        ),
        compiler_params=pltpu.CompilerParams(
            dimension_semantics=("parallel", "parallel", "arbitrary"),
            vmem_limit_bytes=int(vmem_limit),
        ),
        cost_estimate=pl.CostEstimate(
            flops=2 * b_pad_rows * din_pad * dout_pad,
            transcendentals=0,
            bytes_accessed=int(
                2 * b_pad_rows * din_pad * grid_j   # x re-read per j tile
                + 2 * din_pad * dout_pad * grid_i   # w re-read per i tile
                + 4 * b_pad_rows * dout_pad         # f32 output
                + 4 * dout_pad                      # bias
            ),
        ),
    )(x, w_t, b)

    return out[:B, :out_features].astype(orig_dtype)


# ---------------------------------------------------------------------------
# Convertor module (parameter setup / glue in plain JAX)
# ---------------------------------------------------------------------------
class Convertor:
    # TODO(synk): torch .to(device)/.save()/.load() (state-dict I/O) have no
    # Pallas equivalent and are intentionally not implemented.

    def __init__(self, in_dim, out_dim, tied=False, bias=True, key=None,
                 tm=256, tn=512, tk=1024):
        self.tied = tied
        self.bias = bias
        self.tm = tm
        if key is None:
            key = jax.random.PRNGKey(0)
        k1, k2, k3, k4 = jax.random.split(key, 4)

        # PyTorch nn.Linear default init: U(-1/sqrt(fan_in), 1/sqrt(fan_in))
        bound1 = 1.0 / jnp.sqrt(in_dim)
        # convertor_1.weight: [out_dim, in_dim]
        self.w1 = jax.random.uniform(
            k1, (out_dim, in_dim), jnp.float32, -bound1, bound1)
        self.b1 = (jax.random.uniform(k2, (1, out_dim), jnp.float32,
                                      -bound1, bound1) if bias else None)

        bound2 = 1.0 / jnp.sqrt(out_dim)
        if tied:
            # convertor_2.weight = convertor_1.weight.T -> [in_dim, out_dim]
            self.w2 = self.w1.T
        else:
            self.w2 = jax.random.uniform(
                k3, (in_dim, out_dim), jnp.float32, -bound2, bound2)
        self.b2 = (jax.random.uniform(k4, (1, in_dim), jnp.float32,
                                      -bound2, bound2) if bias else None)

        # Pre-transpose + pre-pad + cast to bf16 ONCE.
        # forward: y = x @ w1.T + b1 -> w_t = w1.T   [in_dim,  out_dim]
        # reverse: y = x @ w2.T + b2 -> w_t = w2.T   [out_dim, in_dim]
        #          (tied: w2.T == w1, so no transpose at all)
        w1_t = self.w1.T
        w2_t = self.w1 if tied else self.w2.T
        self._fwd = self._pack(w1_t, self.b1, tn, tk)
        self._rev = self._pack(w2_t, self.b2, tn, tk)

    @staticmethod
    def _pack(w_t, b, tn_pref, tk_pref):
        d_in, d_out = w_t.shape
        din_pad, tk = _pad_and_tile(d_in, tk_pref, 128)
        dout_pad, tn = _pad_and_tile(d_out, tn_pref, 128)
        w_pad = jnp.pad(w_t, ((0, din_pad - d_in), (0, dout_pad - d_out)))
        # bf16 weights: MXU-native, halves HBM weight traffic.
        w_pad = w_pad.astype(jnp.bfloat16)
        if b is None:
            b_pad = jnp.zeros((1, dout_pad), jnp.float32)
        else:
            b_pad = jnp.pad(b.astype(jnp.float32),
                            ((0, 0), (0, dout_pad - d_out)))
        return dict(w=jnp.asarray(w_pad), b=jnp.asarray(b_pad),
                    out_features=d_out, tn=tn, tk=tk)

    def __call__(self, feats, reverse=False):
        p = self._rev if reverse else self._fwd
        return linear_pallas(
            feats, p["w"], p["b"],
            out_features=p["out_features"],
            tn=p["tn"], tk=p["tk"], tm_pref=self.tm,
        )


# ---------------------------------------------------------------------------
# Demo / correctness check
# ---------------------------------------------------------------------------
if __name__ == "__main__":
    key = jax.random.PRNGKey(0)

    def ref_linear(x, w, b):
        # Reference with the same semantics as the kernel: bf16 operands,
        # f32 accumulation.  y = x @ w.T + b
        y = jnp.dot(x.astype(jnp.bfloat16), w.T.astype(jnp.bfloat16),
                    preferred_element_type=jnp.float32)
        return y + (b if b is not None else 0.0)

    # --- small shapes (padding to lane-dense tiles, single K step) ----------
    in_dim, out_dim, batch = 32, 64, 8
    kx, kparams = jax.random.split(key)
    x_fwd = jax.random.normal(kx, (batch, in_dim), jnp.float32)

    conv = Convertor(in_dim, out_dim, tied=False, bias=True, key=kparams)

    y = jax.block_until_ready(conv(x_fwd, reverse=False))
    assert y.shape == (batch, out_dim)
    assert jnp.allclose(y, ref_linear(x_fwd, conv.w1, conv.b1),
                        atol=2e-3, rtol=2e-3)

    x_rev = jax.random.normal(jax.random.PRNGKey(1), (batch, out_dim),
                              jnp.float32)
    z = jax.block_until_ready(conv(x_rev, reverse=True))
    assert z.shape == (batch, in_dim)
    assert jnp.allclose(z, ref_linear(x_rev, conv.w2, conv.b2),
                        atol=2e-3, rtol=2e-3)

    # tied variant: w2 = w1.T  ->  y = x @ w1 + b2
    conv_tied = Convertor(in_dim, out_dim, tied=True, bias=True, key=kparams)
    zt = jax.block_until_ready(conv_tied(x_rev, reverse=True))
    assert jnp.allclose(zt, ref_linear(x_rev, conv_tied.w1.T, conv_tied.b2),
                        atol=2e-3, rtol=2e-3)

    # --- multi-step K reduction + megacore j-split + deep weight pipeline ---
    in2, out2, batch2 = 384, 256, 40   # K padded 384->512 (2 tiles of 256)
    kx2, kp2 = jax.random.split(jax.random.PRNGKey(2))
    conv2 = Convertor(in2, out2, tied=False, bias=True, key=kp2,
                      tn=256, tk=256)
    x2 = jax.random.normal(kx2, (batch2, in2), jnp.float32)
    y2 = jax.block_until_ready(conv2(x2, reverse=False))
    assert y2.shape == (batch2, out2)
    assert jnp.allclose(y2, ref_linear(x2, conv2.w1, conv2.b1),
                        atol=5e-3, rtol=5e-3)

    x2r = jax.random.normal(jax.random.PRNGKey(3), (batch2, out2),
                            jnp.float32)
    z2 = jax.block_until_ready(conv2(x2r, reverse=True))
    assert z2.shape == (batch2, in2)
    assert jnp.allclose(z2, ref_linear(x2r, conv2.w2, conv2.b2),
                        atol=5e-3, rtol=5e-3)

    # --- bias=False path (zeros bias inside the kernel) ----------------------
    conv_nb = Convertor(in_dim, out_dim, tied=False, bias=False, key=kparams)
    ynb = jax.block_until_ready(conv_nb(x_fwd, reverse=False))
    assert jnp.allclose(ynb, ref_linear(x_fwd, conv_nb.w1, None),
                        atol=2e-3, rtol=2e-3)

    print("KERNEL_OK")
</pallas_src>

<mosaic_0001>
module attributes {stable_mosaic.version = 11 : i64} {
  func.func @_matmul_bias_kernel(%arg0: i32, %arg1: i32, %arg2: i32, %arg3: memref<16x128xbf16, #tpu.memory_space<vmem>>, %arg4: memref<128x128xbf16, #tpu.memory_space<vmem>>, %arg5: memref<1x128xf32, #tpu.memory_space<vmem>>, %arg6: memref<16x128xf32, #tpu.memory_space<vmem>>) attributes {dimension_semantics = [#tpu.dimension_semantics<parallel>, #tpu.dimension_semantics<parallel>, #tpu.dimension_semantics<arbitrary>], iteration_bounds = array<i64: 1, 1, 1>, scalar_prefetch = 0 : i64, scratch_operands = 0 : i64, tpu.core_type = #tpu.core_type<tc>, window_params = [{transform_indices = @transform_0, window_bounds = array<i64: 16, 128>}, {transform_indices = @transform_1, window_bounds = array<i64: 128, 128>}, {transform_indices = @transform_2, window_bounds = array<i64: 1, 128>}, {transform_indices = @transform_3, window_bounds = array<i64: 16, 128>}]} {
    %c0_i32 = arith.constant 0 : i32
    %0 = arith.cmpi eq, %arg2, %c0_i32 : i32
    %1 = arith.extui %0 : i1 to i32
    %c0_i32_0 = arith.constant 0 : i32
    %2 = arith.cmpi ne, %1, %c0_i32_0 : i32
    scf.if %2 {
      %cst_10 = arith.constant 0.000000e+00 : f32
      %12 = vector.broadcast %cst_10 : f32 to vector<16x128xf32>
      %c0_11 = arith.constant 0 : index
      %c0_12 = arith.constant 0 : index
      %13 = vector.load %arg6[%c0_11, %c0_12] : memref<16x128xf32, #tpu.memory_space<vmem>>, vector<16x128xf32>
      tpu.vector_store %arg6[%c0_11, %c0_12], %12 {strides = array<i32>} : memref<16x128xf32, #tpu.memory_space<vmem>>, vector<16x128xf32>,
    } else {
    }
    %c0 = arith.constant 0 : index
    %c0_1 = arith.constant 0 : index
    %3 = vector.load %arg6[%c0, %c0_1] : memref<16x128xf32, #tpu.memory_space<vmem>>, vector<16x128xf32>
    %c0_2 = arith.constant 0 : index
    %c0_3 = arith.constant 0 : index
    %4 = vector.load %arg3[%c0_2, %c0_3] : memref<16x128xbf16, #tpu.memory_space<vmem>>, vector<16x128xbf16>
    %c0_4 = arith.constant 0 : index
    %c0_5 = arith.constant 0 : index
    %5 = vector.load %arg4[%c0_4, %c0_5] : memref<128x128xbf16, #tpu.memory_space<vmem>>, vector<128x128xbf16>
    %cst = arith.constant dense<0.000000e+00> : vector<16x128xf32>
    %6 = tpu.matmul %4, %5, %cst {dimension_numbers = #tpu.dot_dimension_numbers<[1], [0], [0], [1], [0, 0, 1, 1], [], []>} : vector<16x128xbf16>, vector<128x128xbf16>, vector<16x128xf32> -> vector<16x128xf32>
    %7 = arith.addf %3, %6 : vector<16x128xf32>
    %c0_6 = arith.constant 0 : index
    %c0_7 = arith.constant 0 : index
    %8 = vector.load %arg6[%c0_6, %c0_7] : memref<16x128xf32, #tpu.memory_space<vmem>>, vector<16x128xf32>
    tpu.vector_store %arg6[%c0_6, %c0_7], %7 {strides = array<i32>} : memref<16x128xf32, #tpu.memory_space<vmem>>, vector<16x128xf32>,
    %c0_i32_8 = arith.constant 0 : i32
    %9 = arith.cmpi eq, %arg2, %c0_i32_8 : i32
    %10 = arith.extui %9 : i1 to i32
    %c0_i32_9 = arith.constant 0 : i32
    %11 = arith.cmpi ne, %10, %c0_i32_9 : i32
    scf.if %11 {
      %c0_10 = arith.constant 0 : index
      %c0_11 = arith.constant 0 : index
      %12 = vector.load %arg6[%c0_10, %c0_11] : memref<16x128xf32, #tpu.memory_space<vmem>>, vector<16x128xf32>
      %c0_12 = arith.constant 0 : index
      %c0_13 = arith.constant 0 : index
      %13 = vector.load %arg5[%c0_12, %c0_13] : memref<1x128xf32, #tpu.memory_space<vmem>>, vector<1x128xf32>
      %14 = vector.broadcast %13 : vector<1x128xf32> to vector<16x128xf32>
      %15 = arith.addf %12, %14 : vector<16x128xf32>
      %c0_14 = arith.constant 0 : index
      %c0_15 = arith.constant 0 : index
      %16 = vector.load %arg6[%c0_14, %c0_15] : memref<16x128xf32, #tpu.memory_space<vmem>>, vector<16x128xf32>
      tpu.vector_store %arg6[%c0_14, %c0_15], %15 {strides = array<i32>} : memref<16x128xf32, #tpu.memory_space<vmem>>, vector<16x128xf32>,
    } else {
    }
    return
  }
  func.func @transform_0(%arg0: i32, %arg1: i32, %arg2: i32) -> (i32, i32) {
    %c0_i32 = arith.constant 0 : i32
    return %arg0, %arg2 : i32, i32
  }
  func.func @transform_1(%arg0: i32, %arg1: i32, %arg2: i32) -> (i32, i32) {
    %c0_i32 = arith.constant 0 : i32
    return %arg2, %arg1 : i32, i32
  }
  func.func @transform_2(%arg0: i32, %arg1: i32, %arg2: i32) -> (i32, i32) {
    %c0_i32 = arith.constant 0 : i32
    %c0_i32_0 = arith.constant 0 : i32
    return %c0_i32, %arg1 : i32, i32
  }
  func.func @transform_3(%arg0: i32, %arg1: i32, %arg2: i32) -> (i32, i32) {
    %c0_i32 = arith.constant 0 : i32
    return %arg0, %arg1 : i32, i32
  }
}

</mosaic_0001>

<bundles_post_ra>
// kernel: linear_pallas.1
= control target key start
LH: loop header
LB: loop body
LE: loop exit
PB: predicated region body
PF: predicated region fallthrough
CT: control target
= control target key end

     0   :  { %8 = vsyncpa [#allocation3], 0  ;;  %s222_s15 = smov [#allocation2]   ;;  %s223_s17 = smov 64   ;;  %s260_s0 = inlined_call_operand.vmem [shape: bf16[16,128], index: 0, kind: input, shape index: {}]   ;;  %s261_s1 = inlined_call_operand.hbm [shape: bf16[128,128], index: 1, kind: input, shape index: {}]   ;;  %s262_s2 = inlined_call_operand.vmem [shape: f32[1,128], index: 2, kind: input, shape index: {}]   ;;  %s263_s3 = inlined_call_operand.vmem [shape: f32[16,128], index: 3, kind: output, shape index: {}]  }
   0x1   :  { %s15_s14 = sshll.u32 %s261_s1, 4  ;;  %s17_s16 = sshll.u32 %s222_s15, 4  ;;  %s16_s14 = int_to_ptr.hbm [resolvable:$true] %s15_s14  ;;  %s18_s16 = int_to_ptr.vmem [resolvable:$true] %s17_s16 }
   0x2   :  { %s224_s18 = smov 4  }
   0x3   :  { %23 = dma.hbm_to_vmem [thread:$0]  %s16_s14, 1024, %s18_s16, [#allocation3], %s223_s17, %s223_s17, %s224_s18  }
   0x4   :  { %220 = dma.done.wait [#allocation3], 1024  }
   0x5   :  { %221 = vsyncadd [#allocation3], 4294966272  ;;  %v190_v0 = vld [vmem:[#allocation2 + $0x38] sm:$0xff]  ;;  %v189_v1 = vld [vmem:[#allocation2 + $0x30] sm:$0xff] }
   0x6   :  { %110 = vmatpush.bf16.msra.mxu0 %v190_v0  ;;  %v188_v2 = vld [vmem:[#allocation2 + $0x28] sm:$0xff]  ;;  %v187_v3 = vld [vmem:[#allocation2 + $0x20] sm:$0xff]  ;;  %v186_v4 = vld [vmem:[#allocation2 + $0x18] sm:$0xff] }
   0x7   :  { %v185_v5 = vld [vmem:[#allocation2 + $0x10] sm:$0xff]  ;;  %v184_v6 = vld [vmem:[#allocation2 + $0x8] sm:$0xff]  ;;  %v183_v7 = vld [vmem:[#allocation2] sm:$0xff] }
   0x8   :  { %v182_v8 = vld [vmem:[%s260_s0] sm:$0xff] }
   0x9   :  { %v195_v9 = vld [vmem:[%s262_s2] ss:$0 sm:$0xff] }
   0xa   :  { %111 = vmatpush.bf16.msra.mxu0 %v189_v1 }
   0xe   :  { %112 = vmatpush.bf16.msra.mxu0 %v188_v2 }
  0x12   :  { %113 = vmatpush.bf16.msra.mxu0 %v187_v3 }
  0x16   :  { %114 = vmatpush.bf16.msra.mxu0 %v186_v4 }
  0x1a   :  { %115 = vmatpush.bf16.msra.mxu0 %v185_v5 }
  0x1e   :  { %116 = vmatpush.bf16.msra.mxu0 %v184_v6 }
  0x22   :  { %117 = vmatpush.bf16.msra.mxu0 %v183_v7 }
  0x25   :  { %118 = vmatmul.bf16.vlgmr.msra.gmra.mxu0 %v182_v8 }
  0xa2   :  { %v119_v10 = vpop.f32.mrf.mxu0 }
  0xa3   :  { %v137_v11 = vadd.f32 %v195_v9, %v119_v10 }
  0xa5   :  { %139 = vst [vmem:[%s263_s3] sm:$0xff] %v137_v11 }
  0xaa   :  { %v121_v12 = vpop.f32.mrf.mxu0 }
  0xab   :  { %v138_v13 = vadd.f32 %v195_v9, %v121_v12 }
  0xad   :  { %140 = vst [vmem:[%s263_s3 + $0x8] sm:$0xff] %v138_v13 }
  0xae   :  { %145 = vsyncpa [#allocation3], 1 }

</bundles_post_ra>
